<compile_context>
chip_gen: v6e
topology: v6e:2x2x1
jax: 0.10.0
libtpu: 0.0.40
codegen_flags: <defaults>
</compile_context>

<pallas_src>
import functools

import jax
import jax.numpy as jnp
from jax.experimental import pallas as pl
from jax.experimental.pallas import tpu as pltpu


def _round_up(x: int, m: int) -> int:
    return ((x + m - 1) // m) * m


def _apply_activation(x, activation: str):
    # NOTE: all supported activations satisfy f(0) == 0, so the zero rows used for
    # "same" conv padding and the inter-batch gaps stay zero after the activation.
    if activation == "ReLU":
        return jnp.maximum(x, 0.0)
    if activation == "GELU":
        # PyTorch nn.GELU default is the exact erf form (review correctness note).
        return jax.nn.gelu(x, approximate=False)
    if activation == "Tanh":
        return jnp.tanh(x)
    if activation == "SiLU":
        return x * jax.nn.sigmoid(x)
    raise ValueError(f"unsupported activation: {activation}")


def convblock_kernel(x_ref, lo_ref, hi_ref, w_ref, b_ref, g_ref, beta_ref, o_ref,
                     acth_ref, *, kernel_size: int, pad: int, d_model: int,
                     d_padded: int, eps: float, activation: str):
    # x_ref:    (tT, Dp)     one row tile (activation input), channels padded to Dp
    # lo_ref:   (8,  Dp)     the 8 rows immediately BEFORE this tile (halo source)
    # hi_ref:   (8,  Dp)     the 8 rows immediately AFTER  this tile (halo source)
    # w_ref:    (K, Dp, Dp)  bf16 conv weights; w_ref[k] = W_k with (in, out) layout
    # b_ref:    (1, Dp)      conv bias   (zero in padded lanes)
    # g_ref:    (1, Dp)      LN gamma    (zero in padded lanes)
    # beta_ref: (1, Dp)      LN beta     (zero in padded lanes)
    # o_ref:    (tT, Dp)
    # acth_ref: (tT+16, Dp)  bf16 VMEM scratch holding the haloed activation
    K = kernel_size
    tT, Dp = x_ref.shape
    f32 = jnp.float32
    bf16 = jnp.bfloat16

    # Activation in f32 on the VPU (v5e has no bf16 VPU/EUP), stored as the bf16 MXU
    # LHS into the haloed scratch: rows [8, 8+tT) = this tile, rows [8-pad, 8) and
    # [8+tT, 8+tT+pad) come from the neighbour views.  All three stores are
    # sublane-aligned full blocks: no masked/misaligned stores and no scratch zeroing.
    acth_ref[pl.ds(8, tT), :] = _apply_activation(
        x_ref[...].astype(f32), activation).astype(bf16)
    acth_ref[pl.ds(0, 8), :] = _apply_activation(
        lo_ref[...].astype(f32), activation).astype(bf16)
    acth_ref[pl.ds(8 + tT, 8), :] = _apply_activation(
        hi_ref[...].astype(f32), activation).astype(bf16)
    # TODO(synk): nn.Dropout(0.1) is identity in eval mode; training-mode masking
    # (pltpu.prng_seed + prng_random_bits) is not emitted here.

    # "Same"-padded conv1d as K accumulated MXU matmuls with f32 accumulation.
    # lhs_k[t] = act[t + k - pad]: a (tT, Dp) bf16 window of the haloed scratch.
    # K-1 of the K reads are sublane-shifted by < 8 rows; that shift/select work runs
    # on otherwise idle VPU/XLU slots and replaces the old per-k roll+iota+where, and
    # the (T, K*Dp) f32 intermediate of the previous version is gone.
    acc = jnp.zeros((tT, Dp), f32)
    for k in range(K):
        lhs = acth_ref[pl.ds(8 - pad + k, tT), :]
        acc = acc + jnp.dot(lhs, w_ref[k], preferred_element_type=f32)
    acc = acc + b_ref[...].astype(f32)

    # LayerNorm over the real d_model channels.  Padded lanes of acc are exactly zero
    # (zero-padded weights/bias), so sum / d_model gives the masked mean; the variance
    # uses the centered two-pass form (review note) with padded lanes masked out.
    inv_d = 1.0 / d_model
    mean = jnp.sum(acc, axis=-1, keepdims=True) * inv_d
    centered = acc - mean
    if d_padded != d_model:
        lane = jax.lax.broadcasted_iota(jnp.int32, (tT, Dp), 1)
        centered = jnp.where(lane < d_model, centered, 0.0)
    var = jnp.sum(centered * centered, axis=-1, keepdims=True) * inv_d
    out = centered * jax.lax.rsqrt(var + eps)
    out = out * g_ref[...].astype(f32) + beta_ref[...].astype(f32)
    o_ref[...] = out.astype(o_ref.dtype)


def _vmem_limit_bytes() -> int:
    # Generation-aware VMEM budget (review #6): ~3/4 of physical, capped at 100 MiB
    # (v5e/v6e: 128 MiB physical -> 96 MiB; v7x: 64 MiB -> 48 MiB).
    mib = 1024 * 1024
    try:
        phys = int(pltpu.get_tpu_info().vmem_capacity_bytes)
        return max(min(3 * phys // 4, 100 * mib), 32 * mib)
    except Exception:
        return 32 * mib


def convblock_forward(x_bdt, conv_w, conv_b, gamma, beta, *, kernel_size: int,
                      activation: str = "ReLU", eps: float = 1e-5,
                      tile_rows: int = 512):
    """x_bdt: (B, D, T) as in PyTorch Conv1d.  Returns (B, D, T)."""
    B, D, T = x_bdt.shape
    K = kernel_size
    assert K % 2 == 1, "even kernel_size changes the Conv1d output length in PyTorch"
    pad = (K - 1) // 2
    assert pad <= 8, "halo scheme assumes (kernel_size - 1) // 2 <= 8"

    Dp = _round_up(D, 128)            # lane-dense channels: unmasked MXU lanes & stores
    dpad = Dp - D

    # Flatten (B, T) -> rows with a `pad`-row zero gap after every batch element, so
    # the conv window never crosses a batch boundary and "same" zero padding is free.
    Tg = T + pad                      # per-batch row stride
    L = B * Tg                        # real flat rows (incl. gaps)
    tT = min(_round_up(tile_rows, 8), _round_up(L, 8))   # row-tile size (mult of 8)
    nL = pl.cdiv(L, tT)
    Lm = nL * tT                      # output rows (tile-aligned)
    Lp = (nL + 2) * tT                # input rows: one zero tile front + back (halo src)

    # --- layout glue (plain JAX; XLA fuses the transpose/pad/reshape chain) ---------
    x_rows = jnp.transpose(x_bdt, (0, 2, 1))                        # (B, T, D)
    x_rows = jnp.pad(x_rows, ((0, 0), (0, Tg - T), (0, dpad)))      # (B, Tg, Dp)
    x_flat = x_rows.reshape(B * Tg, Dp)
    x_flat = jnp.pad(x_flat, ((tT, Lp - tT - L), (0, 0)))           # (Lp, Dp)

    # conv_w (D_out, D_in, K) -> (K, D_in_p, D_out_p) bf16; padded taps/lanes are zero.
    w_kio = jnp.transpose(conv_w, (2, 1, 0))
    w_kio = jnp.pad(w_kio, ((0, 0), (0, dpad), (0, dpad))).astype(jnp.bfloat16)
    b_2d = jnp.pad(conv_b, (0, dpad)).reshape(1, Dp).astype(jnp.float32)
    g_2d = jnp.pad(gamma, (0, dpad)).reshape(1, Dp).astype(jnp.float32)
    beta_2d = jnp.pad(beta, (0, dpad)).reshape(1, Dp).astype(jnp.float32)

    kernel = functools.partial(convblock_kernel, kernel_size=K, pad=pad, d_model=D,
                               d_padded=Dp, eps=eps, activation=activation)

    t8 = tT // 8                      # halo views are 8-row blocks of the same array
    itemsize = jnp.dtype(x_bdt.dtype).itemsize
    flops = 2 * Lm * Dp * Dp * K
    transcendentals = Lm * Dp if activation in ("GELU", "Tanh", "SiLU") else 0
    bytes_accessed = (x_flat.size + Lm * Dp) * itemsize + w_kio.size * 2 + 3 * Dp * 4

    out_flat = pl.pallas_call(
        kernel,
        out_shape=jax.ShapeDtypeStruct((Lm, Dp), x_bdt.dtype),
        grid_spec=pltpu.PrefetchScalarGridSpec(
            num_scalar_prefetch=0,
            grid=(nL,),
            in_specs=[
                pl.BlockSpec((tT, Dp), lambda j: (j + 1, 0)),            # row tile
                pl.BlockSpec((8, Dp), lambda j: ((j + 1) * t8 - 1, 0)),  # 8 rows before
                pl.BlockSpec((8, Dp), lambda j: ((j + 2) * t8, 0)),      # 8 rows after
                # Constant index maps below: Pallas DMAs these blocks only once.
                pl.BlockSpec((K, Dp, Dp), lambda j: (0, 0, 0)),          # conv weights
                pl.BlockSpec((1, Dp), lambda j: (0, 0)),                 # conv bias
                pl.BlockSpec((1, Dp), lambda j: (0, 0)),                 # LN gamma
                pl.BlockSpec((1, Dp), lambda j: (0, 0)),                 # LN beta
            ],
            out_specs=pl.BlockSpec((tT, Dp), lambda j: (j, 0)),
            scratch_shapes=[pltpu.VMEM((tT + 16, Dp), jnp.bfloat16)],    # haloed act
        ),
        compiler_params=pltpu.CompilerParams(
            dimension_semantics=("parallel",),   # independent row tiles -> both v7x TCs
            vmem_limit_bytes=_vmem_limit_bytes(),
        ),
        cost_estimate=pl.CostEstimate(flops=flops, transcendentals=transcendentals,
                                      bytes_accessed=bytes_accessed),
    )(x_flat, x_flat, x_flat, w_kio, b_2d, g_2d, beta_2d)

    out = out_flat[:L].reshape(B, Tg, Dp)[:, :T, :D]     # drop gaps / channel padding
    return jnp.transpose(out, (0, 2, 1))                 # back to (B, D, T)


def convblock_reference(x_bdt, conv_w, conv_b, gamma, beta, *,
                        kernel_size: int, activation: str = "ReLU", eps: float = 1e-5):
    """Pure-JAX (f32) reference matching the PyTorch forward (eval mode)."""
    pad = (kernel_size - 1) // 2
    a = _apply_activation(x_bdt.astype(jnp.float32), activation)
    y = jax.lax.conv_general_dilated(
        a, conv_w.astype(jnp.float32), window_strides=(1,), padding=[(pad, pad)],
        dimension_numbers=("NCH", "OIH", "NCH"))
    y = y + conv_b[None, :, None]
    y = jnp.transpose(y, (0, 2, 1))                      # (B, T, D)
    mean = y.mean(-1, keepdims=True)
    var = ((y - mean) ** 2).mean(-1, keepdims=True)
    y = (y - mean) / jnp.sqrt(var + eps) * gamma + beta
    return jnp.transpose(y, (0, 2, 1))                   # (B, D, T)


if __name__ == "__main__":
    B, D, T, K = 2, 32, 16, 3          # hidden_size=32, kernel_size=3, seq=16
    activation = "ReLU"

    key = jax.random.PRNGKey(0)
    kx, kw, kb = jax.random.split(key, 3)

    x = jax.random.normal(kx, (B, D, T), dtype=jnp.float32)              # PyTorch NCL
    conv_w = jax.random.normal(kw, (D, D, K), dtype=jnp.float32) * 0.05  # (out, in, k)
    conv_b = jax.random.normal(kb, (D,), dtype=jnp.float32) * 0.05
    conv_b = conv_b + 0.3                                                # nonzero mean
    gamma = jnp.ones((D,), jnp.float32)                                  # nn.LayerNorm init
    beta = jnp.zeros((D,), jnp.float32)

    ref = convblock_reference(x, conv_w, conv_b, gamma, beta,
                              kernel_size=K, activation=activation)

    # Default tiling: everything (both batch elements) fits in one grid step.
    out = convblock_forward(x, conv_w, conv_b, gamma, beta,
                            kernel_size=K, activation=activation)
    out = jax.block_until_ready(out)
    assert out.shape == (B, D, T)
    # bf16 MXU operands (f32 accumulation): tolerance loosened vs. all-f32 math.
    assert jnp.allclose(out, ref, atol=3e-2, rtol=3e-2), "mismatch (single tile)"

    # Tiny tile size: forces multiple row tiles so the halo path (tile and batch
    # boundaries) is exercised as well.
    out_tiled = convblock_forward(x, conv_w, conv_b, gamma, beta,
                                  kernel_size=K, activation=activation, tile_rows=8)
    out_tiled = jax.block_until_ready(out_tiled)
    assert jnp.allclose(out_tiled, ref, atol=3e-2, rtol=3e-2), "mismatch (multi tile)"

    print("KERNEL_OK")
</pallas_src>

<mosaic_0001>
module attributes {stable_mosaic.version = 11 : i64} {
  func.func @convblock_kernel(%arg0: i32, %arg1: memref<40x128xf32, #tpu.memory_space<vmem>>, %arg2: memref<8x128xf32, #tpu.memory_space<vmem>>, %arg3: memref<8x128xf32, #tpu.memory_space<vmem>>, %arg4: memref<3x128x128xbf16, #tpu.memory_space<vmem>>, %arg5: memref<1x128xf32, #tpu.memory_space<vmem>>, %arg6: memref<1x128xf32, #tpu.memory_space<vmem>>, %arg7: memref<1x128xf32, #tpu.memory_space<vmem>>, %arg8: memref<40x128xf32, #tpu.memory_space<vmem>>, %arg9: memref<56x128xbf16, #tpu.memory_space<vmem>>) attributes {dimension_semantics = [#tpu.dimension_semantics<parallel>], iteration_bounds = array<i64: 1>, scalar_prefetch = 0 : i64, scratch_operands = 1 : i64, tpu.core_type = #tpu.core_type<tc>, window_params = [{transform_indices = @transform_0, window_bounds = array<i64: 40, 128>}, {transform_indices = @transform_1, window_bounds = array<i64: 8, 128>}, {transform_indices = @transform_2, window_bounds = array<i64: 8, 128>}, {pipeline_mode = #tpu.pipeline_mode<synchronous>, transform_indices = @transform_3, window_bounds = array<i64: 3, 128, 128>}, {pipeline_mode = #tpu.pipeline_mode<synchronous>, transform_indices = @transform_4, window_bounds = array<i64: 1, 128>}, {pipeline_mode = #tpu.pipeline_mode<synchronous>, transform_indices = @transform_5, window_bounds = array<i64: 1, 128>}, {pipeline_mode = #tpu.pipeline_mode<synchronous>, transform_indices = @transform_6, window_bounds = array<i64: 1, 128>}, {transform_indices = @transform_7, window_bounds = array<i64: 40, 128>}]} {
    %c0 = arith.constant 0 : index
    %c0_0 = arith.constant 0 : index
    %0 = vector.load %arg1[%c0, %c0_0] : memref<40x128xf32, #tpu.memory_space<vmem>>, vector<40x128xf32>
    %cst = arith.constant 0.000000e+00 : f32
    %1 = vector.broadcast %cst : f32 to vector<40x128xf32>
    %2 = arith.maximumf %0, %1 : vector<40x128xf32>
    %3 = arith.truncf %2 : vector<40x128xf32> to vector<40x128xbf16>
    %c8 = arith.constant 8 : index
    %c0_1 = arith.constant 0 : index
    %4 = vector.load %arg9[%c8, %c0_1] : memref<56x128xbf16, #tpu.memory_space<vmem>>, vector<40x128xbf16>
    tpu.vector_store %arg9[%c8, %c0_1], %3 {strides = array<i32>} : memref<56x128xbf16, #tpu.memory_space<vmem>>, vector<40x128xbf16>,
    %c0_2 = arith.constant 0 : index
    %c0_3 = arith.constant 0 : index
    %5 = vector.load %arg2[%c0_2, %c0_3] : memref<8x128xf32, #tpu.memory_space<vmem>>, vector<8x128xf32>
    %cst_4 = arith.constant 0.000000e+00 : f32
    %6 = vector.broadcast %cst_4 : f32 to vector<8x128xf32>
    %7 = arith.maximumf %5, %6 : vector<8x128xf32>
    %8 = arith.truncf %7 : vector<8x128xf32> to vector<8x128xbf16>
    %c0_5 = arith.constant 0 : index
    %c0_6 = arith.constant 0 : index
    %9 = vector.load %arg9[%c0_5, %c0_6] : memref<56x128xbf16, #tpu.memory_space<vmem>>, vector<8x128xbf16>
    tpu.vector_store %arg9[%c0_5, %c0_6], %8 {strides = array<i32>} : memref<56x128xbf16, #tpu.memory_space<vmem>>, vector<8x128xbf16>,
    %c0_7 = arith.constant 0 : index
    %c0_8 = arith.constant 0 : index
    %10 = vector.load %arg3[%c0_7, %c0_8] : memref<8x128xf32, #tpu.memory_space<vmem>>, vector<8x128xf32>
    %cst_9 = arith.constant 0.000000e+00 : f32
    %11 = vector.broadcast %cst_9 : f32 to vector<8x128xf32>
    %12 = arith.maximumf %10, %11 : vector<8x128xf32>
    %13 = arith.truncf %12 : vector<8x128xf32> to vector<8x128xbf16>
    %c48 = arith.constant 48 : index
    %c0_10 = arith.constant 0 : index
    %14 = vector.load %arg9[%c48, %c0_10] : memref<56x128xbf16, #tpu.memory_space<vmem>>, vector<8x128xbf16>
    tpu.vector_store %arg9[%c48, %c0_10], %13 {strides = array<i32>} : memref<56x128xbf16, #tpu.memory_space<vmem>>, vector<8x128xbf16>,
    %cst_11 = arith.constant 0.000000e+00 : f32
    %15 = vector.broadcast %cst_11 : f32 to vector<40x128xf32>
    %c7 = arith.constant 7 : index
    %c0_12 = arith.constant 0 : index
    %16 = vector.load %arg9[%c7, %c0_12] : memref<56x128xbf16, #tpu.memory_space<vmem>>, vector<40x128xbf16>
    %c0_13 = arith.constant 0 : index
    %c0_14 = arith.constant 0 : index
    %c0_15 = arith.constant 0 : index
    %17 = vector.load %arg4[%c0_13, %c0_14, %c0_15] : memref<3x128x128xbf16, #tpu.memory_space<vmem>>, vector<1x128x128xbf16>
    %18 = vector.shape_cast %17 : vector<1x128x128xbf16> to vector<128x128xbf16>
    %cst_16 = arith.constant dense<0.000000e+00> : vector<40x128xf32>
    %19 = tpu.matmul %16, %18, %cst_16 {dimension_numbers = #tpu.dot_dimension_numbers<[1], [0], [0], [1], [0, 0, 1, 1], [], []>} : vector<40x128xbf16>, vector<128x128xbf16>, vector<40x128xf32> -> vector<40x128xf32>
    %20 = arith.addf %15, %19 : vector<40x128xf32>
    %c8_17 = arith.constant 8 : index
    %c0_18 = arith.constant 0 : index
    %21 = vector.load %arg9[%c8_17, %c0_18] : memref<56x128xbf16, #tpu.memory_space<vmem>>, vector<40x128xbf16>
    %c1 = arith.constant 1 : index
    %c0_19 = arith.constant 0 : index
    %c0_20 = arith.constant 0 : index
    %22 = vector.load %arg4[%c1, %c0_19, %c0_20] : memref<3x128x128xbf16, #tpu.memory_space<vmem>>, vector<1x128x128xbf16>
    %23 = vector.shape_cast %22 : vector<1x128x128xbf16> to vector<128x128xbf16>
    %cst_21 = arith.constant dense<0.000000e+00> : vector<40x128xf32>
    %24 = tpu.matmul %21, %23, %cst_21 {dimension_numbers = #tpu.dot_dimension_numbers<[1], [0], [0], [1], [0, 0, 1, 1], [], []>} : vector<40x128xbf16>, vector<128x128xbf16>, vector<40x128xf32> -> vector<40x128xf32>
    %25 = arith.addf %20, %24 : vector<40x128xf32>
    %c9 = arith.constant 9 : index
    %c0_22 = arith.constant 0 : index
    %26 = vector.load %arg9[%c9, %c0_22] : memref<56x128xbf16, #tpu.memory_space<vmem>>, vector<40x128xbf16>
    %c2 = arith.constant 2 : index
    %c0_23 = arith.constant 0 : index
    %c0_24 = arith.constant 0 : index
    %27 = vector.load %arg4[%c2, %c0_23, %c0_24] : memref<3x128x128xbf16, #tpu.memory_space<vmem>>, vector<1x128x128xbf16>
    %28 = vector.shape_cast %27 : vector<1x128x128xbf16> to vector<128x128xbf16>
    %cst_25 = arith.constant dense<0.000000e+00> : vector<40x128xf32>
    %29 = tpu.matmul %26, %28, %cst_25 {dimension_numbers = #tpu.dot_dimension_numbers<[1], [0], [0], [1], [0, 0, 1, 1], [], []>} : vector<40x128xbf16>, vector<128x128xbf16>, vector<40x128xf32> -> vector<40x128xf32>
    %30 = arith.addf %25, %29 : vector<40x128xf32>
    %c0_26 = arith.constant 0 : index
    %c0_27 = arith.constant 0 : index
    %31 = vector.load %arg5[%c0_26, %c0_27] : memref<1x128xf32, #tpu.memory_space<vmem>>, vector<1x128xf32>
    %32 = vector.broadcast %31 : vector<1x128xf32> to vector<40x128xf32>
    %33 = arith.addf %30, %32 : vector<40x128xf32>
    %cst_28 = arith.constant dense<0.000000e+00> : vector<40xf32>
    %34 = vector.multi_reduction <add>, %33, %cst_28 [1] : vector<40x128xf32> to vector<40xf32>
    %35 = vector.shape_cast %34 : vector<40xf32> to vector<40x1xf32>
    %cst_29 = arith.constant 3.125000e-02 : f32
    %36 = vector.broadcast %cst_29 : f32 to vector<40x1xf32>
    %37 = arith.mulf %35, %36 : vector<40x1xf32>
    %38 = vector.broadcast %37 : vector<40x1xf32> to vector<40x128xf32>
    %39 = arith.subf %33, %38 : vector<40x128xf32>
    %40 = tpu.iota {dimensions = array<i32: 1>} : vector<40x128xi32>
    %c32_i32 = arith.constant 32 : i32
    %41 = vector.broadcast %c32_i32 : i32 to vector<40x128xi32>
    %42 = arith.cmpi slt, %40, %41 : vector<40x128xi32>
    %cst_30 = arith.constant 0.000000e+00 : f32
    %43 = vector.broadcast %cst_30 : f32 to vector<40x128xf32>
    %44 = arith.select %42, %39, %43 : vector<40x128xi1>, vector<40x128xf32>
    %45 = arith.mulf %44, %44 : vector<40x128xf32>
    %cst_31 = arith.constant dense<0.000000e+00> : vector<40xf32>
    %46 = vector.multi_reduction <add>, %45, %cst_31 [1] : vector<40x128xf32> to vector<40xf32>
    %47 = vector.shape_cast %46 : vector<40xf32> to vector<40x1xf32>
    %cst_32 = arith.constant 3.125000e-02 : f32
    %48 = vector.broadcast %cst_32 : f32 to vector<40x1xf32>
    %49 = arith.mulf %47, %48 : vector<40x1xf32>
    %cst_33 = arith.constant 9.99999974E-6 : f32
    %50 = vector.broadcast %cst_33 : f32 to vector<40x1xf32>
    %51 = arith.addf %49, %50 : vector<40x1xf32>
    %52 = math.rsqrt %51 : vector<40x1xf32>
    %53 = vector.broadcast %52 : vector<40x1xf32> to vector<40x128xf32>
    %54 = arith.mulf %44, %53 : vector<40x128xf32>
    %c0_34 = arith.constant 0 : index
    %c0_35 = arith.constant 0 : index
    %55 = vector.load %arg6[%c0_34, %c0_35] : memref<1x128xf32, #tpu.memory_space<vmem>>, vector<1x128xf32>
    %56 = vector.broadcast %55 : vector<1x128xf32> to vector<40x128xf32>
    %57 = arith.mulf %54, %56 : vector<40x128xf32>
    %c0_36 = arith.constant 0 : index
    %c0_37 = arith.constant 0 : index
    %58 = vector.load %arg7[%c0_36, %c0_37] : memref<1x128xf32, #tpu.memory_space<vmem>>, vector<1x128xf32>
    %59 = vector.broadcast %58 : vector<1x128xf32> to vector<40x128xf32>
    %60 = arith.addf %57, %59 : vector<40x128xf32>
    %c0_38 = arith.constant 0 : index
    %c0_39 = arith.constant 0 : index
    %61 = vector.load %arg8[%c0_38, %c0_39] : memref<40x128xf32, #tpu.memory_space<vmem>>, vector<40x128xf32>
    tpu.vector_store %arg8[%c0_38, %c0_39], %60 {strides = array<i32>} : memref<40x128xf32, #tpu.memory_space<vmem>>, vector<40x128xf32>,
    return
  }
  func.func @transform_0(%arg0: i32) -> (i32, i32) {
    %c1_i32 = arith.constant 1 : i32
    %0 = arith.addi %arg0, %c1_i32 : i32
    %c0_i32 = arith.constant 0 : i32
    %c0_i32_0 = arith.constant 0 : i32
    return %0, %c0_i32 : i32, i32
  }
  func.func @transform_1(%arg0: i32) -> (i32, i32) {
    %c1_i32 = arith.constant 1 : i32
    %0 = arith.addi %arg0, %c1_i32 : i32
    %c5_i32 = arith.constant 5 : i32
    %1 = arith.muli %0, %c5_i32 : i32
    %c1_i32_0 = arith.constant 1 : i32
    %2 = arith.subi %1, %c1_i32_0 : i32
    %c0_i32 = arith.constant 0 : i32
    %c0_i32_1 = arith.constant 0 : i32
    return %2, %c0_i32 : i32, i32
  }
  func.func @transform_2(%arg0: i32) -> (i32, i32) {
    %c2_i32 = arith.constant 2 : i32
    %0 = arith.addi %arg0, %c2_i32 : i32
    %c5_i32 = arith.constant 5 : i32
    %1 = arith.muli %0, %c5_i32 : i32
    %c0_i32 = arith.constant 0 : i32
    %c0_i32_0 = arith.constant 0 : i32
    return %1, %c0_i32 : i32, i32
  }
  func.func @transform_3(%arg0: i32) -> (i32, i32, i32) {
    %c0_i32 = arith.constant 0 : i32
    %c0_i32_0 = arith.constant 0 : i32
    %c0_i32_1 = arith.constant 0 : i32
    %c0_i32_2 = arith.constant 0 : i32
    return %c0_i32, %c0_i32_0, %c0_i32_1 : i32, i32, i32
  }
  func.func @transform_4(%arg0: i32) -> (i32, i32) {
    %c0_i32 = arith.constant 0 : i32
    %c0_i32_0 = arith.constant 0 : i32
    %c0_i32_1 = arith.constant 0 : i32
    return %c0_i32, %c0_i32_0 : i32, i32
  }
  func.func @transform_5(%arg0: i32) -> (i32, i32) {
    %c0_i32 = arith.constant 0 : i32
    %c0_i32_0 = arith.constant 0 : i32
    %c0_i32_1 = arith.constant 0 : i32
    return %c0_i32, %c0_i32_0 : i32, i32
  }
  func.func @transform_6(%arg0: i32) -> (i32, i32) {
    %c0_i32 = arith.constant 0 : i32
    %c0_i32_0 = arith.constant 0 : i32
    %c0_i32_1 = arith.constant 0 : i32
    return %c0_i32, %c0_i32_0 : i32, i32
  }
  func.func @transform_7(%arg0: i32) -> (i32, i32) {
    %c0_i32 = arith.constant 0 : i32
    %c0_i32_0 = arith.constant 0 : i32
    return %arg0, %c0_i32 : i32, i32
  }
}

</mosaic_0001>

<bundles_post_ra>
// kernel: tpu_custom_call.1
= control target key start
LH: loop header
LB: loop body
LE: loop exit
PB: predicated region body
PF: predicated region fallthrough
CT: control target
= control target key end

     0   :  { %12 = vsyncpa [#allocation4], 0  ;;  %s1241_s0 = inlined_call_operand.hbm [shape: f32[120,128], index: 0, kind: input, shape index: {}]   ;;  %s1242_s1 = inlined_call_operand.hbm [shape: f32[120,128], index: 1, kind: input, shape index: {}]   ;;  %s1243_s2 = inlined_call_operand.hbm [shape: f32[120,128], index: 2, kind: input, shape index: {}]   ;;  %s1244_s3 = inlined_call_operand.hbm [shape: bf16[3,128,128], index: 3, kind: input, shape index: {}]   ;;  %s1245_s4 = inlined_call_operand.vmem [shape: f32[1,128], index: 4, kind: input, shape index: {}]   ;;  %s1246_s5 = inlined_call_operand.vmem [shape: f32[1,128], index: 5, kind: input, shape index: {}]   ;;  %s1247_s6 = inlined_call_operand.vmem [shape: f32[1,128], index: 6, kind: input, shape index: {}]   ;;  %s1248_s7 = inlined_call_operand.hbm [shape: f32[40,128], index: 7, kind: output, shape index: {}]  }
   0x1   :  { %13 = vsyncpa [#allocation7], 0 }
   0x2   :  { %14 = vsyncpa [#allocation10], 0  ;;  %s41_s26 = scalar_lea.hbm %s1242_s1, 512 }
   0x3   :  { %15 = vsyncpa [#allocation5], 0  ;;  %s1103_s27 = smov [#allocation6]   ;;  %s738_s8 = scalar_lea.hbm %s1241_s0, 640 }
   0x4   :  { %s43_s28 = sshll.u32 %s1103_s27, 4  ;;  %s44_s28 = int_to_ptr.vmem [resolvable:$true] %s43_s28 }
   0x5   :  { %s996_s9 = scalar_lea.vmem %s44_s28, 128  ;;  %p1001_p1 = scmp.lt.s32.totalorder %s44_s28, %s44_s28 }
   0x6   :  { %p997_p0 = scmp.ne.s32.totalorder %s44_s28, %s996_s9  ;;  %p1002_p2 = scmp.lt.s32.totalorder %s996_s9, %s996_s9 }
   0x8   :  { %p1003_p3 = por %p1002_p2, %p1001_p1 }
   0xa   :  { %p1004_p4 = pnand %p1003_p3, %p997_p0 }
   0xc   :  { %1007 = shalt.err (!%p1004_p4)
}
   0xd   :  { %46 = dma.hbm_to_vmem [thread:$0]  %s41_s26, 128, %s44_s28, [#allocation7]  }
   0xe   :  { %s1104_s10 = smov [#allocation3]  }
   0xf   :  { %s25_s11 = sshll.u32 %s1104_s10, 4  ;;  %s26_s11 = int_to_ptr.vmem [resolvable:$true] %s25_s11 }
  0x10   :  { %s1019_s1 = scalar_lea.vmem %s26_s11, 640  ;;  %p1024_p6 = scmp.lt.s32.totalorder %s26_s11, %s26_s11 }
  0x11   :  { %p1020_p5 = scmp.ne.s32.totalorder %s26_s11, %s1019_s1  ;;  %p1025_p7 = scmp.lt.s32.totalorder %s1019_s1, %s1019_s1 }
  0x13   :  { %p1026_p8 = por %p1025_p7, %p1024_p6 }
  0x15   :  { %p1027_p9 = pnand %p1026_p8, %p1020_p5 }
  0x17   :  { %1030 = shalt.err (!%p1027_p9)
}
  0x18   :  { %s1105_s0 = smov 128   ;;  %s1106_s12 = smov 8  }
  0x19   :  { %31 = dma.hbm_to_vmem [thread:$0]  %s738_s8, 640, %s26_s11, [#allocation4], %s1105_s0, %s1105_s0, %s1106_s12  }
  0x1a   :  { %s741_s15 = scalar_lea.hbm %s1243_s2, 1280  ;;  %s1107_s16 = smov [#allocation8]  }
  0x1b   :  { %s57_s17 = sshll.u32 %s1107_s16, 4  ;;  %s1108_s18 = smov [#allocation9]   ;;  %s58_s17 = int_to_ptr.vmem [resolvable:$true] %s57_s17 }
  0x1c   :  { %s66_s19 = sshll.u32 %s1108_s18, 4  ;;  %s1042_s20 = scalar_lea.vmem %s58_s17, 128  ;;  %s67_s19 = int_to_ptr.vmem [resolvable:$true] %s66_s19 }
  0x1d   :  { %p1043_p10 = scmp.ne.s32.totalorder %s58_s17, %s1042_s20  ;;  %p1047_p11 = scmp.lt.s32.totalorder %s58_s17, %s58_s17 }
  0x1e   :  { %p1048_p12 = scmp.lt.s32.totalorder %s1042_s20, %s1042_s20 }
  0x20   :  { %p1049_p13 = por %p1048_p12, %p1047_p11 }
  0x22   :  { %p1050_p0 = pnand %p1049_p13, %p1043_p10 }
  0x24   :  { %1053 = shalt.err (!%p1050_p0)
}
  0x25   :  { %60 = dma.hbm_to_vmem [thread:$0]  %s741_s15, 128, %s58_s17, [#allocation7]  }
  0x26   :  { %s1063_s21 = scalar_lea.vmem %s67_s19, 3072  ;;  %p1068_p2 = scmp.lt.s32.totalorder %s67_s19, %s67_s19 }
  0x27   :  { %p1064_p1 = scmp.ne.s32.totalorder %s67_s19, %s1063_s21  ;;  %p1069_p3 = scmp.lt.s32.totalorder %s1063_s21, %s1063_s21 }
  0x29   :  { %p1070_p4 = por %p1069_p3, %p1068_p2 }
  0x2b   :  { %p1071_p5 = pnand %p1070_p4, %p1064_p1 }
  0x2d   :  { %1074 = shalt.err (!%p1071_p5)
}
  0x2e   :  { %s1109_s2 = smov 64   ;;  %s1110_s22 = smov 4  }
  0x2f   :  { %72 = dma.hbm_to_vmem [thread:$0]  %s1244_s3, 3072, %s67_s19, [#allocation10], %s1109_s2, %s1109_s2, %s1110_s22  }
  0x30   :  { %1095 = dma.done.wait [#allocation4], 640  }
  0x31   :  { %1096 = vsyncadd [#allocation4], 4294966656 }
  0x32   :  { %1097 = dma.done.wait [#allocation7], 256  }
  0x33   :  { %1098 = vsyncadd [#allocation7], 4294967040 }
  0x34   :  { %1099 = dma.done.wait [#allocation10], 3072  }
  0x35   :  { %1100 = vsyncadd [#allocation10], 4294964224  ;;  %v1111_v0 = vmov 0.0   ;;  %vm1112_vm0 = vmmov 0   ;;  %v944_v1 = vld [vmem:[#allocation9 + $0x78] sm:$0xff]   ;;  %v946_v3 = vld [vmem:[#allocation9 + $0x70] sm:$0xff]  }
  0x36   :  { %833 = vmatprep.subr.bf16.mxu0 %v1111_v0  ;;  %861 = vmatprep.subr.bf16.mxu1 %v1111_v0  ;;  %v945_v2 = vld [vmem:[#allocation9 + $0x38] sm:$0xff]   ;;  %v947_v4 = vld [vmem:[#allocation9 + $0x30] sm:$0xff]   ;;  %v948_v5 = vld [vmem:[#allocation9 + $0x68] sm:$0xff]   ;;  %vm307_vm1 = vsmask.f32 4352 }
  0x37   :  { %849 = vmatprep.mubr.msk.bf16.mxu0 %vm1112_vm0, %v1111_v0  ;;  %877 = vmatprep.mubr.msk.bf16.mxu1 %vm1112_vm0, %v1111_v0  ;;  %v949_v6 = vld [vmem:[#allocation9 + $0x28] sm:$0xff]   ;;  %v950_v7 = vld [vmem:[#allocation9 + $0x60] sm:$0xff]   ;;  %v952_v9 = vld [vmem:[#allocation9 + $0x58] sm:$0xff]   ;;  %vm479_vm2 = vsmask.f32 7424 }
  0x38   :  { %834 = vmatpush3.bf16.msra.mxu0 %v944_v1  ;;  %862 = vmatpush3.bf16.msra.mxu1 %v945_v2  ;;  %v951_v8 = vld [vmem:[#allocation9 + $0x20] sm:$0xff]   ;;  %v953_v10 = vld [vmem:[#allocation9 + $0x18] sm:$0xff]   ;;  %v99_v11 = vld [vmem:[#allocation3] sm:$0xff] }
  0x39   :  { %835 = vmatprep.subr.bf16.mxu0 %v1111_v0  ;;  %863 = vmatprep.subr.bf16.mxu1 %v1111_v0  ;;  %v100_v12 = vld [vmem:[#allocation3 + $0x8] sm:$0xff]  ;;  %v101_v13 = vld [vmem:[#allocation3 + $0x10] sm:$0xff]  ;;  %v104_v14 = vmax.f32 %v99_v11, 0.0  ;;  %v102_v24 = vld [vmem:[#allocation3 + $0x18] sm:$0xff] }
  0x3a   :  { %v105_v15 = vmax.f32 %v100_v12, 0.0  ;;  %v106_v16 = vmax.f32 %v101_v13, 0.0  ;;  %v135_v17 = vld [vmem:[#allocation6] sm:$0xff]  ;;  %v103_v25 = vld [vmem:[#allocation3 + $0x20] sm:$0xff]  ;;  %v107_v26 = vmax.f32 %v102_v24, 0.0  ;;  %v958_v31 = vld [vmem:[#allocation9 + $0x40] sm:$0xff]  }
  0x3b   :  { %v954_v18 = vld [vmem:[#allocation9 + $0x50] sm:$0xff]   ;;  %v136_v19 = vmax.f32 %v135_v17, 0.0  ;;  %v783_v21 = vpack.c.bf16 %v104_v14, %v104_v14  ;;  %v956_v27 = vld [vmem:[#allocation9 + $0x48] sm:$0xff]   ;;  %v108_v28 = vmax.f32 %v103_v25, 0.0  ;;  %v139_v32 = vld [vmem:[#allocation8] sm:$0xff] }
  0x3c   :  { %836 = vmatpush3.bf16.msra.mxu0 %v946_v3  ;;  %864 = vmatpush3.bf16.msra.mxu1 %v947_v4  ;;  %v955_v20 = vld [vmem:[#allocation9 + $0x10] sm:$0xff]   ;;  %v791_v22 = vpack.c.bf16 %v106_v16, %v105_v15  ;;  %v957_v29 = vld [vmem:[#allocation9 + $0x8] sm:$0xff]   ;;  %v959_v33 = vld [vmem:[#allocation9] sm:$0xff]   ;;  %v140_v34 = vmax.f32 %v139_v32, 0.0 }
  0x3d   :  { %837 = vmatprep.subr.bf16.mxu0 %v1111_v0  ;;  %865 = vmatprep.subr.bf16.mxu1 %v1111_v0  ;;  %v137_v23 = vpack.c.bf16 %v136_v19, %v136_v19  ;;  %130 = vst [vmem:[#allocation2 + $0x4] sm:$0xf] %v783_v21  ;;  %v796_v30 = vpack.c.bf16 %v108_v28, %v107_v26  ;;  %v963_v43 = vld [vmem:[#allocation9 + $0xb8] sm:$0xff]   ;;  %v964_v54 = vld [vmem:[#allocation9 + $0xb0] sm:$0xff]   ;;  %v965_v62 = vld [vmem:[#allocation9 + $0xa8] sm:$0xff]  }
  0x3e   :  { %798 = vst [vmem:[#allocation2 + $0x8] sm:$0xff] %v791_v22   ;;  %v141_v41 = vpack.c.bf16 %v140_v34, %v140_v34  ;;  %v967_v3 = vld [vmem:[#allocation9 + $0xa0] sm:$0xff]   ;;  %v971_v11 = vld [vmem:[#allocation9 + $0x88] sm:$0xff]  }
  0x3f   :  { %138 = vst [vmem:[#allocation2] sm:$0xf] %v137_v23  ;;  %799 = vst [vmem:[#allocation2 + $0x10] sm:$0xff] %v796_v30   ;;  %v972_v16 = vld [vmem:[#allocation9 + $0x80] sm:$0xff]  }
  0x40   :  { %838 = vmatpush3.bf16.msra.mxu0 %v948_v5  ;;  %866 = vmatpush3.bf16.msra.mxu1 %v949_v6  ;;  %142 = vst [vmem:[#allocation2 + $0x18] sm:$0xf] %v141_v41  ;;  %v968_v6 = vld [vmem:[#allocation9 + $0x98] sm:$0xff]  }
  0x41   :  { %839 = vmatprep.subr.bf16.mxu0 %v1111_v0  ;;  %867 = vmatprep.subr.bf16.mxu1 %v1111_v0 }
  0x44   :  { %840 = vmatpush3.bf16.msra.mxu0 %v950_v7  ;;  %868 = vmatpush3.bf16.msra.mxu1 %v951_v8  ;;  %v144_v35 = vld [vmem:[#allocation2 + $0x4] sm:$0xf] }
  0x45   :  { %841 = vmatprep.subr.bf16.mxu0 %v1111_v0  ;;  %869 = vmatprep.subr.bf16.mxu1 %v1111_v0  ;;  %v145_v36 = vld [vmem:[#allocation2 + $0x8] sm:$0xf]  ;;  %v146_v37 = vld [vmem:[#allocation2 + $0xc] sm:$0xf] }
  0x46   :  { %v143_v38 = vld [vmem:[#allocation2] sm:$0x8]  ;;  %v747_v39 = vcombine.low %v144_v35, %v145_v36  ;;  %v759_v40 = vcombine.low %v145_v36, %v146_v37  ;;  %v147_v50 = vld [vmem:[#allocation2 + $0x10] sm:$0xf]  ;;  %v148_v51 = vld [vmem:[#allocation2 + $0x14] sm:$0xf] }
  0x47   :  { %v758_v42 = vcombine.low %v143_v38, %v144_v35  ;;  %v760_v55 = vcombine.low %v147_v50, %v148_v51  ;;  %v748_v60 = vcombine.low %v146_v37, %v147_v50  ;;  %v749_v5 = vcombine.low %v148_v51, %v148_v51  ;;  %v973_v7 = vld [vmem:[#allocation2 + $0x4] sm:$0xff]   ;;  %v975_v15 = vld [vmem:[#allocation2 + $0x14] sm:$0x1f]  }
  0x48   :  { %842 = vmatpush3.bf16.msra.mxu0 %v952_v9  ;;  %870 = vmatpush3.bf16.msra.mxu1 %v953_v10  ;;  %v317_v44 = vshrl.u32 %v759_v40, 16  ;;  %v320_v45 = vshll.u32 %v759_v40, 16  ;;  %v970_v8 = vld [vmem:[#allocation9 + $0x90] sm:$0xff]   ;;  %v483_v9 = vshll.u32 %v973_v7, 16  ;;  %v974_v10 = vld [vmem:[#allocation2 + $0xc] sm:$0xff]   ;;  %v481_v12 = vshrl.u32 %v973_v7, 16 }
  0x49   :  { %843 = vmatprep.subr.bf16.mxu0 %v1111_v0  ;;  %871 = vmatprep.subr.bf16.mxu1 %v1111_v0  ;;  %v309_v46 = vshrl.u32 %v758_v42, 16  ;;  %v312_v47 = vshll.u32 %v758_v42, 16  ;;  %v326_v58 = vshrl.u32 %v760_v55, 16  ;;  %v329_v59 = vshll.u32 %v760_v55, 16 }
  0x4a   :  { %v319_v48 = vrot.slane %v317_v44, 3  ;;  %v322_v49 = vrot.slane %v320_v45, 4  ;;  %v485_v13 = vrot.slane %v483_v9, 1  ;;  %v488_v14 = vshll.u32 %v974_v10, 16 }
  0x4b   :  { %v311_v52 = vrot.slane %v309_v46, 3  ;;  %v314_v53 = vrot.slane %v312_v47, 4  ;;  %v328_v63 = vrot.slane %v326_v58, 3  ;;  %v331_v1 = vrot.slane %v329_v59, 4 }
  0x4c   :  { %844 = vmatpush3.bf16.msra.mxu0 %v954_v18  ;;  %872 = vmatpush3.bf16.msra.mxu1 %v955_v20  ;;  %v323_v56 = vor.u32 %v322_v49, %v319_v48  ;;  %v486_v17 = vor.u32 %v485_v13, %v481_v12  ;;  %v490_v18 = vrot.slane %v488_v14, 1  ;;  %v492_v19 = vshrl.u32 %v974_v10, 16 }
  0x4d   :  { %845 = vmatprep.subr.bf16.mxu0 %v1111_v0  ;;  %873 = vmatprep.subr.bf16.mxu1 %v1111_v0  ;;  %v315_v57 = vor.u32 %v314_v53, %v311_v52  ;;  %v332_v2 = vor.u32 %v331_v1, %v328_v63  ;;  %v496_v20 = vshll.u32 %v975_v15, 16  ;;  %v500_v25 = vshrl.u32 %v975_v15, 16  ;;  %v780_v52 = vld [vmem:[%s1245_s4] ss:$0 sm:$0xff] }
  0x4e   :  { %v491_v21 = vsel %vm479_vm2, %v486_v17, %v490_v18  ;;  %v494_v22 = vor.u32 %v492_v19, %v490_v18  ;;  %v647_v15 = vlaneseq }
  0x4f   :  { %v324_v61 = vsel %vm307_vm1, %v315_v57, %v323_v56  ;;  %v333_v4 = vsel %vm307_vm1, %v323_v56, %v332_v2  ;;  %v498_v23 = vrot.slane %v496_v20, 1 }
  0x50   :  { %846 = vmatpush3.bf16.msra.mxu0 %v956_v27  ;;  %874 = vmatpush3.bf16.msra.mxu1 %v957_v29 }
  0x51   :  { %847 = vmatprep.subr.bf16.mxu0 %v1111_v0  ;;  %875 = vmatprep.subr.bf16.mxu1 %v1111_v0  ;;  %v499_v24 = vsel %vm479_vm2, %v494_v22, %v498_v23  ;;  %v502_v26 = vor.u32 %v500_v25, %v498_v23 }
  0x54   :  { %848 = vmatpush3.bf16.msra.mxu0 %v958_v31  ;;  %876 = vmatpush3.bf16.msra.mxu1 %v959_v33 }
  0x55   :  { %889 = vmatprep.subr.bf16.mxu0 %v1111_v0  ;;  %917 = vmatprep.subr.bf16.mxu1 %v1111_v0 }
  0x57   :  { %850 = vmatmul.mubr.bf16.vlgmr.msra.gmra.mxu0 %v747_v39  ;;  %878 = vmatmul.mubr.bf16.vlgmr.msra.gmra.mxu1 %v324_v61 }
  0x58   :  { %890 = vmatpush3.bf16.msra.mxu0 %v963_v43  ;;  %853 = vmatprep.mubr.msk.bf16.mxu0 %vm1112_vm0, %v1111_v0 }
  0x59   :  { %891 = vmatprep.subr.bf16.mxu0 %v1111_v0  ;;  %925 = vmatpush3.bf16.msra.mxu1 %v963_v43 }
  0x5a   :  { %881 = vmatprep.mubr.msk.bf16.mxu1 %vm1112_vm0, %v1111_v0  ;;  %918 = vmatprep.subr.bf16.mxu1 %v1111_v0 }
  0x5c   :  { %892 = vmatpush3.bf16.msra.mxu0 %v964_v54 }
  0x5d   :  { %893 = vmatprep.subr.bf16.mxu0 %v1111_v0  ;;  %926 = vmatpush3.bf16.msra.mxu1 %v964_v54 }
  0x5e   :  { %919 = vmatprep.subr.bf16.mxu1 %v1111_v0 }
  0x5f   :  { %854 = vmatmul.mubr.bf16.gmra.mxu0 %v748_v60  ;;  %882 = vmatmul.mubr.bf16.gmra.mxu1 %v333_v4 }
  0x60   :  { %894 = vmatpush3.bf16.msra.mxu0 %v965_v62  ;;  %857 = vmatprep.mubr.msk.bf16.mxu0 %vm1112_vm0, %v1111_v0 }
  0x61   :  { %895 = vmatprep.subr.bf16.mxu0 %v1111_v0  ;;  %927 = vmatpush3.bf16.msra.mxu1 %v965_v62 }
  0x62   :  { %885 = vmatprep.mubr.msk.bf16.mxu1 %vm1112_vm0, %v1111_v0  ;;  %920 = vmatprep.subr.bf16.mxu1 %v1111_v0 }
  0x64   :  { %896 = vmatpush3.bf16.msra.mxu0 %v967_v3 }
  0x65   :  { %897 = vmatprep.subr.bf16.mxu0 %v1111_v0  ;;  %928 = vmatpush3.bf16.msra.mxu1 %v967_v3 }
  0x66   :  { %921 = vmatprep.subr.bf16.mxu1 %v1111_v0 }
  0x67   :  { %858 = vmatmul.mubr.bf16.gmra.mxu0 %v749_v5  ;;  %886 = vmatmul.mubr.bf16.gmra.mxu1 %v332_v2 }
  0x68   :  { %898 = vmatpush3.bf16.msra.mxu0 %v968_v6  ;;  %905 = vmatprep.mubr.msk.bf16.mxu0 %vm1112_vm0, %v1111_v0 }
  0x69   :  { %899 = vmatprep.subr.bf16.mxu0 %v1111_v0  ;;  %929 = vmatpush3.bf16.msra.mxu1 %v968_v6 }
  0x6a   :  { %909 = vmatprep.mubr.msk.bf16.mxu1 %vm1112_vm0, %v1111_v0  ;;  %922 = vmatprep.subr.bf16.mxu1 %v1111_v0 }
  0x6c   :  { %900 = vmatpush3.bf16.msra.mxu0 %v970_v8 }
  0x6d   :  { %901 = vmatprep.subr.bf16.mxu0 %v1111_v0  ;;  %930 = vmatpush3.bf16.msra.mxu1 %v970_v8 }
  0x6e   :  { %923 = vmatprep.subr.bf16.mxu1 %v1111_v0 }
  0x70   :  { %902 = vmatpush3.bf16.msra.mxu0 %v971_v11 }
  0x71   :  { %903 = vmatprep.subr.bf16.mxu0 %v1111_v0  ;;  %931 = vmatpush3.bf16.msra.mxu1 %v971_v11 }
  0x72   :  { %924 = vmatprep.subr.bf16.mxu1 %v1111_v0 }
  0x74   :  { %904 = vmatpush3.bf16.msra.mxu0 %v972_v16 }
  0x75   :  { %932 = vmatpush3.bf16.msra.mxu1 %v972_v16  ;;  %v648_v16 = vand.u32 127, %v647_v15 }
  0x77   :  { %906 = vmatmul.mubr.bf16.vlgmr.msra.gmra.mxu0 %v491_v21  ;;  %vm649_vm3 = vcmp.lt.s32.totalorder %v648_v16, 32 }
  0x78   :  { %910 = vmatmul.mubr.bf16.vlgmr.msra.gmra.mxu1 %v499_v24 }
  0x79   :  { %913 = vmatprep.mubr.msk.bf16.mxu1 %vm1112_vm0, %v1111_v0 }
  0x80   :  { %914 = vmatmul.mubr.bf16.gmra.mxu1 %v502_v26 }
 0x117   :  { %v280_v27 = vpop.f32.mrf.mxu0  ;;  %v419_v30 = vpop.f32.mrf.mxu1 }
 0x118   :  { %v420_v50 = vadd.f32 %v419_v30, %v280_v27 }
 0x119   :  { %v851_v28 = vpop.f32.mrf.mxu0  ;;  %v879_v32 = vpop.f32.mrf.mxu1 }
 0x11b   :  { %v283_v29 = vpop.f32.mrf.mxu0  ;;  %v422_v34 = vpop.f32.mrf.mxu1 }
 0x11c   :  { %v423_v55 = vadd.f32 %v422_v34, %v283_v29 }
 0x11d   :  { %v852_v31 = vpop.f32.mrf.mxu0  ;;  %v880_v36 = vpop.f32.mrf.mxu1 }
 0x11f   :  { %v288_v33 = vpop.f32.mrf.mxu0  ;;  %v427_v38 = vpop.f32.mrf.mxu1 }
 0x120   :  { %v428_v58 = vadd.f32 %v427_v38, %v288_v33 }
 0x121   :  { %v855_v35 = vpop.f32.mrf.mxu0  ;;  %v883_v40 = vpop.f32.mrf.mxu1 }
 0x123   :  { %v291_v37 = vpop.f32.mrf.mxu0  ;;  %v430_v42 = vpop.f32.mrf.mxu1 }
 0x124   :  { %v431_v2 = vadd.f32 %v430_v42, %v291_v37 }
 0x125   :  { %v856_v39 = vpop.f32.mrf.mxu0  ;;  %v884_v0 = vpop.f32.mrf.mxu1 }
 0x127   :  { %v296_v41 = vpop.f32.mrf.mxu0  ;;  %v435_v45 = vpop.f32.mrf.mxu1 }
 0x128   :  { %v436_v7 = vadd.f32 %v435_v45, %v296_v41 }
 0x129   :  { %v859_v43 = vpop.f32.mrf.mxu0  ;;  %v887_v47 = vpop.f32.mrf.mxu1 }
 0x12b   :  { %v299_v44 = vpop.f32.mrf.mxu0  ;;  %v438_v48 = vpop.f32.mrf.mxu1 }
 0x12d   :  { %v860_v46 = vpop.f32.mrf.mxu0  ;;  %v888_v49 = vpop.f32.mrf.mxu1 }
 0x137   :  { %v588_v51 = vpop.f32.mrf.mxu0 }
 0x138   :  { %v610_v53 = vadd.f32 %v588_v51, %v420_v50  ;;  %v596_v60 = vpop.f32.mrf.mxu1 }
 0x139   :  { %v907_v54 = vpop.f32.mrf.mxu0  ;;  %v612_v62 = vadd.f32 %v596_v60, %v428_v58 }
 0x13a   :  { %v622_v56 = vadd.f32 %v780_v52, %v610_v53  ;;  %v911_v1 = vpop.f32.mrf.mxu1 }
 0x13b   :  { %v591_v57 = vpop.f32.mrf.mxu0  ;;  %v624_v3 = vadd.f32 %v780_v52, %v612_v62 }
 0x13c   :  { %v611_v59 = vadd.f32 %v591_v57, %v423_v55  ;;  %627 = vadd.xlane.f32.xlu0 %v622_v56  ;;  %v599_v4 = vpop.f32.mrf.mxu1  ;;  %v781_v57 = vld [vmem:[%s1246_s5] ss:$0 sm:$0xff]  ;;  %s1113_s5 = smov [#allocation11]  }
 0x13d   :  { %v908_v61 = vpop.f32.mrf.mxu0  ;;  %v613_v5 = vadd.f32 %v599_v4, %v431_v2  ;;  %631 = vadd.xlane.f32.xlu1 %v624_v3 }
 0x13e   :  { %v623_v63 = vadd.f32 %v780_v52, %v611_v59  ;;  %v912_v6 = vpop.f32.mrf.mxu1  ;;  %v782_v59 = vld [vmem:[%s1247_s6] ss:$0 sm:$0xff]  ;;  %s724_s6 = sshll.u32 %s1113_s5, 4  ;;  %s725_s6 = int_to_ptr.vmem [resolvable:$true] %s724_s6 }
 0x13f   :  { %v625_v8 = vadd.f32 %v780_v52, %v613_v5  ;;  %s1075_s29 = scalar_lea.vmem %s725_s6, 640  ;;  %p1080_p7 = scmp.lt.s32.totalorder %s725_s6, %s725_s6 }
 0x140   :  { %629 = vadd.xlane.f32.xlu0 %v623_v63  ;;  %v604_v9 = vpop.f32.mrf.mxu1  ;;  %p1076_p6 = scmp.ne.s32.totalorder %s725_s6, %s1075_s29  ;;  %p1081_p8 = scmp.lt.s32.totalorder %s1075_s29, %s1075_s29 }
 0x141   :  { %v614_v10 = vadd.f32 %v604_v9, %v436_v7  ;;  %633 = vadd.xlane.f32.xlu1 %v625_v8 }
 0x142   :  { %v915_v11 = vpop.f32.mrf.mxu1  ;;  %p1082_p9 = por %p1081_p8, %p1080_p7 }
 0x143   :  { %v626_v12 = vadd.f32 %v780_v52, %v614_v10 }
 0x144   :  { %v607_v13 = vpop.f32.mrf.mxu1  ;;  %p1083_p10 = pnand %p1082_p9, %p1076_p6 }
 0x145   :  { %635 = vadd.xlane.f32.xlu0 %v626_v12 }
 0x146   :  { %v916_v14 = vpop.f32.mrf.mxu1 }
 0x1c5   :  { %v628_v17 = vpop.xlane.xlu0 %627 }
 0x1c6   :  { %v637_v18 = vmul.f32 0.03125, %v628_v17  ;;  %v632_v23 = vpop.xlane.xlu1 %631 }
 0x1c7   :  { %v639_v25 = vmul.f32 0.03125, %v632_v23 }
 0x1c8   :  { %v642_v19 = vsub.f32 %v622_v56, %v637_v18 }
 0x1c9   :  { %v630_v20 = vpop.xlane.xlu0 %629  ;;  %v644_v27 = vsub.f32 %v624_v3, %v639_v25 }
 0x1ca   :  { %v638_v21 = vmul.f32 0.03125, %v630_v20  ;;  %v650_v22 = vsel %vm649_vm3, %v642_v19, 0.0  ;;  %v634_v29 = vpop.xlane.xlu1 %633 }
 0x1cb   :  { %v655_v24 = vmul.f32 %v650_v22, %v650_v22  ;;  %v640_v31 = vmul.f32 0.03125, %v634_v29  ;;  %v652_v32 = vsel %vm649_vm3, %v644_v27, 0.0 }
 0x1cc   :  { %v643_v26 = vsub.f32 %v623_v63, %v638_v21  ;;  %v657_v33 = vmul.f32 %v652_v32, %v652_v32 }
 0x1cd   :  { %660 = vadd.xlane.f32.xlu1 %v655_v24  ;;  %v645_v34 = vsub.f32 %v625_v8, %v640_v31 }
 0x1ce   :  { %v651_v28 = vsel %vm649_vm3, %v643_v26, 0.0  ;;  %v636_v35 = vpop.xlane.xlu0 %635 }
 0x1cf   :  { %v656_v30 = vmul.f32 %v651_v28, %v651_v28  ;;  %v641_v36 = vmul.f32 0.03125, %v636_v35  ;;  %v653_v37 = vsel %vm649_vm3, %v645_v34, 0.0 }
 0x1d0   :  { %v658_v38 = vmul.f32 %v653_v37, %v653_v37 }
 0x1d1   :  { %662 = vadd.xlane.f32.xlu0 %v656_v30  ;;  %664 = vadd.xlane.f32.xlu1 %v657_v33  ;;  %v646_v39 = vsub.f32 %v626_v12, %v641_v36 }
 0x1d3   :  { %v654_v40 = vsel %vm649_vm3, %v646_v39, 0.0 }
 0x1d4   :  { %v659_v41 = vmul.f32 %v654_v40, %v654_v40 }
 0x1d5   :  { %666 = vadd.xlane.f32.xlu0 %v658_v38 }
 0x1d6   :  { %668 = vadd.xlane.f32.xlu1 %v659_v41 }
 0x256   :  { %v661_v42 = vpop.xlane.xlu1 %660 }
 0x257   :  { %v670_v43 = vmul.f32 0.03125, %v661_v42 }
 0x259   :  { %v675_v0 = vadd.f32 1e-05, %v670_v43 }
 0x25a   :  { %v663_v44 = vpop.xlane.xlu0 %662  ;;  %v665_v46 = vpop.xlane.xlu1 %664 }
 0x25b   :  { %976 = vrsqrt.f32 %v675_v0  ;;  %v671_v45 = vmul.f32 0.03125, %v663_v44  ;;  %v672_v47 = vmul.f32 0.03125, %v665_v46 }
 0x25d   :  { %v676_v48 = vadd.f32 1e-05, %v671_v45  ;;  %v677_v49 = vadd.f32 1e-05, %v672_v47 }
 0x25e   :  { %v667_v50 = vpop.xlane.xlu0 %666 }
 0x25f   :  { %978 = vrsqrt.f32 %v676_v48  ;;  %v673_v51 = vmul.f32 0.03125, %v667_v50  ;;  %v669_v53 = vpop.xlane.xlu1 %668 }
 0x260   :  { %980 = vrsqrt.f32 %v677_v49  ;;  %v674_v54 = vmul.f32 0.03125, %v669_v53 }
 0x261   :  { %v678_v52 = vadd.f32 1e-05, %v673_v51 }
 0x262   :  { %v679_v55 = vadd.f32 1e-05, %v674_v54 }
 0x263   :  { %982 = vrsqrt.f32 %v678_v52 }
 0x264   :  { %984 = vrsqrt.f32 %v679_v55 }
 0x268   :  { %v977_v56 = vpop.eup %976 }
 0x269   :  { %v685_v58 = vmul.f32 %v977_v56, %v650_v22 }
 0x26b   :  { %v697_v60 = vmul.f32 %v781_v57, %v685_v58 }
 0x26c   :  { %v979_v61 = vpop.eup %978 }
 0x26d   :  { %v686_v62 = vmul.f32 %v979_v61, %v651_v28  ;;  %v709_v63 = vadd.f32 %v782_v59, %v697_v60  ;;  %v981_v1 = vpop.eup %980 }
 0x26e   :  { %v687_v2 = vmul.f32 %v981_v1, %v652_v32 }
 0x26f   :  { %v698_v3 = vmul.f32 %v781_v57, %v686_v62  ;;  %714 = vst [vmem:[#allocation11] sm:$0xff] %v709_v63 }
 0x270   :  { %v699_v4 = vmul.f32 %v781_v57, %v687_v2  ;;  %v983_v6 = vpop.eup %982 }
 0x271   :  { %v710_v5 = vadd.f32 %v782_v59, %v698_v3  ;;  %v688_v7 = vmul.f32 %v983_v6, %v653_v37  ;;  %v985_v10 = vpop.eup %984 }
 0x272   :  { %v711_v8 = vadd.f32 %v782_v59, %v699_v4  ;;  %v689_v11 = vmul.f32 %v985_v10, %v654_v40 }
 0x273   :  { %715 = vst [vmem:[#allocation11 + $0x8] sm:$0xff] %v710_v5  ;;  %v700_v9 = vmul.f32 %v781_v57, %v688_v7 }
 0x274   :  { %716 = vst [vmem:[#allocation11 + $0x10] sm:$0xff] %v711_v8  ;;  %v701_v13 = vmul.f32 %v781_v57, %v689_v11 }
 0x275   :  { %v712_v12 = vadd.f32 %v782_v59, %v700_v9 }
 0x276   :  { %v713_v14 = vadd.f32 %v782_v59, %v701_v13 }
 0x277   :  { %717 = vst [vmem:[#allocation11 + $0x18] sm:$0xff] %v712_v12 }
 0x278   :  { %718 = vst [vmem:[#allocation11 + $0x20] sm:$0xff] %v713_v14 }
 0x279   :  { %1086 = shalt.err (!%p1083_p10)
}
 0x27a   :  { %730 = dma.vmem_to_hbm [thread:$0]  %s725_s6, 640, %s1248_s7, [#allocation5], %s1105_s0, %s1105_s0, %s1106_s12  }
 0x27b   :  { %1101 = dma.done.wait [#allocation5], 640  }
 0x27c   :  { %1102 = vsyncadd [#allocation5], 4294966656 }
 0x27d   :  { %734 = vsyncpa [#allocation4], 1 }
 0x27e   :  { %735 = vsyncpa [#allocation7], 1 }
 0x27f   :  { %736 = vsyncpa [#allocation10], 1 }
 0x280   :  { %737 = vsyncpa [#allocation5], 1 }

</bundles_post_ra>
